<compile_context>
chip_gen: v6e
topology: v6e:2x2x1
jax: 0.10.0
libtpu: 0.0.40
codegen_flags: <defaults>
</compile_context>

<pallas_src>
import math

import jax
import jax.numpy as jnp
from jax.experimental import pallas as pl
from jax.experimental.pallas import tpu as pltpu


def _adaptive_bins(in_size: int, out_size: int):
    """PyTorch adaptive-pooling bin boundaries (static, trace-time)."""
    bins = []
    for i in range(out_size):
        start = (i * in_size) // out_size
        end = ((i + 1) * in_size + out_size - 1) // out_size  # integer ceil
        bins.append((start, end))
    return bins


def _largest_divisor_leq(n: int, cap: int) -> int:
    cap = max(1, min(n, cap))
    for d in range(cap, 0, -1):
        if n % d == 0:
            return d
    return 1


def _vmem_capacity_bytes() -> int:
    """Physical VMEM of the local TPU generation (conservative fallback)."""
    try:
        info = pltpu.get_tpu_info()
        cap = int(getattr(info, "vmem_capacity_bytes", 0) or 0)
        if cap > 0:
            return cap
    except Exception:
        pass
    return 64 << 20  # v7x-sized conservative default


def _make_kernel(Nb, Cb, H, W, out_h, out_w):
    identity = (out_h == H and out_w == W)

    if identity:
        # Degenerate case: max == avg == x.  Pure streaming copy.
        def kernel(x_ref, o_ref):
            v = x_ref[...]                                    # (Nb, Cb, H, W)
            o_ref[...] = jnp.stack([v, v], axis=1).astype(o_ref.dtype)
        return kernel

    h_bins = _adaptive_bins(H, out_h)
    w_bins = _adaptive_bins(W, out_w)

    def kernel(x_ref, o_ref):
        # ---- pass 1: reduce H per output-row bin (sublane-axis slices) ----
        hm_rows, hs_rows = [], []
        for (h0, h1) in h_bins:
            win = x_ref[:, :, h0:h1, :]                       # (Nb, Cb, nh, W)
            hm_rows.append(jnp.max(win, axis=2, keepdims=True))
            hs_rows.append(
                jnp.sum(win, axis=2, keepdims=True, dtype=jnp.float32)
                * (1.0 / float(h1 - h0)))
        hm = hm_rows[0] if out_h == 1 else jnp.concatenate(hm_rows, axis=2)
        hs = hs_rows[0] if out_h == 1 else jnp.concatenate(hs_rows, axis=2)
        # hm, hs: (Nb, Cb, out_h, W)

        # ---- pass 2: reduce W per output-col bin (lane-axis slices) ----
        m_cols, a_cols = [], []
        for (w0, w1) in w_bins:
            m_cols.append(jnp.max(hm[..., w0:w1], axis=3, keepdims=True))
            a_cols.append(
                jnp.sum(hs[..., w0:w1], axis=3, keepdims=True)
                * (1.0 / float(w1 - w0)))
        mx = m_cols[0] if out_w == 1 else jnp.concatenate(m_cols, axis=3)
        av = a_cols[0] if out_w == 1 else jnp.concatenate(a_cols, axis=3)
        # mx, av: (Nb, Cb, out_h, out_w)

        # Single lane/sublane-aligned store of the whole output block.
        o_ref[...] = jnp.stack(
            [mx.astype(o_ref.dtype), av.astype(o_ref.dtype)], axis=1)

    return kernel


def adaptive_concat_pool2d(x, out_size):
    """x: (N, C, H, W) -> (N, 2*C, H_out, W_out); max channels first, then avg."""
    N, C, H, W = x.shape

    if out_size is None:
        out_h, out_w = H, W
    elif isinstance(out_size, int):
        out_h, out_w = out_size, out_size
    else:
        oh, ow = out_size
        out_h = H if oh is None else oh
        out_w = W if ow is None else ow

    itemsize = jnp.dtype(x.dtype).itemsize
    vmem_cap = _vmem_capacity_bytes()
    # Target footprint for all buffers of one grid step (double buffers,
    # live working set, intermediates) - leave headroom for compiler scratch.
    usable = int(vmem_cap * 0.6)

    identity = (out_h == H and out_w == W)
    h_bins = _adaptive_bins(H, out_h)

    def est_vmem(nb, cb):
        in_blk = nb * cb * H * W * itemsize
        out_blk = nb * 2 * cb * out_h * out_w * itemsize
        if identity:
            work = 3 * in_blk                      # loaded value + stacked copy
        else:
            max_bin = max(h1 - h0 for (h0, h1) in h_bins)
            # largest live window (native for max + f32 upcast for the sum)
            work = nb * cb * max_bin * W * (itemsize + 4)
            # H-reduced intermediates (native max + f32 sum)
            work += nb * cb * out_h * W * (itemsize + 4)
            # final pooled tiles
            work += 2 * nb * cb * out_h * out_w * (itemsize + 4)
        return 2 * in_blk + 2 * out_blk + work + (2 << 20)

    # ---- block selection: prefer Cb == C (fully contiguous DMA), tile N;
    #      tile C (any divisor - C is a middle block dim) only if needed. ----
    if est_vmem(1, C) <= usable:
        Cb = C
        Nb = N
        while Nb > 1 and est_vmem(Nb, C) > usable:
            Nb = _largest_divisor_leq(N, Nb - 1)
    else:
        Nb = 1
        Cb = next((d for d in range(C, 0, -1)
                   if C % d == 0 and est_vmem(1, d) <= usable), 1)

    # ---- make sure there are >= 2 grid steps when the problem is non-trivial
    #      (v7x has 2 TensorCores; "parallel" only helps with >= 2 steps). ----
    steps = (N // Nb) * (C // Cb)
    if steps == 1 and N * C * H * W * itemsize >= (2 << 20):
        if N >= 2:
            Nb = _largest_divisor_leq(N, (N + 1) // 2)
        elif C >= 2:
            Cb = _largest_divisor_leq(C, (C + 1) // 2)

    grid = (N // Nb, C // Cb)
    kernel = _make_kernel(Nb, Cb, H, W, out_h, out_w)

    vmem_needed = est_vmem(Nb, Cb)
    vmem_limit = max(32 << 20, int(vmem_needed * 1.25) + (4 << 20))
    vmem_limit = min(vmem_limit, int(vmem_cap * 0.9))
    vmem_limit = int(max(vmem_limit, min(vmem_needed + (1 << 20), vmem_cap)))

    out5 = pl.pallas_call(
        kernel,
        out_shape=jax.ShapeDtypeStruct((N, 2, C, out_h, out_w), x.dtype),
        grid_spec=pltpu.PrefetchScalarGridSpec(
            num_scalar_prefetch=0,
            grid=grid,
            in_specs=[pl.BlockSpec((Nb, Cb, H, W), lambda n, c: (n, c, 0, 0))],
            out_specs=pl.BlockSpec((Nb, 2, Cb, out_h, out_w),
                                   lambda n, c: (n, 0, c, 0, 0)),
        ),
        compiler_params=pltpu.CompilerParams(
            dimension_semantics=("parallel", "parallel"),
            vmem_limit_bytes=vmem_limit,
        ),
    )(x)

    # (N, 2, C, oh, ow) -> (N, 2C, oh, ow) is a free row-major reshape and
    # reproduces torch.cat([max, avg], dim=1) channel order exactly.
    return out5.reshape(N, 2 * C, out_h, out_w)


def _reference(x, out_size):
    """Pure-JAX reference with PyTorch adaptive-pooling semantics (NCHW)."""
    N, C, H, W = x.shape
    if out_size is None:
        out_h, out_w = H, W
    elif isinstance(out_size, int):
        out_h, out_w = out_size, out_size
    else:
        oh, ow = out_size
        out_h = H if oh is None else oh
        out_w = W if ow is None else ow
    h_bins = _adaptive_bins(H, out_h)
    w_bins = _adaptive_bins(W, out_w)
    mx = jnp.zeros((N, C, out_h, out_w), x.dtype)
    av = jnp.zeros((N, C, out_h, out_w), x.dtype)
    for i, (h0, h1) in enumerate(h_bins):
        for j, (w0, w1) in enumerate(w_bins):
            win = x[:, :, h0:h1, w0:w1]
            mx = mx.at[:, :, i, j].set(jnp.max(win, axis=(2, 3)))
            av = av.at[:, :, i, j].set(jnp.mean(win, axis=(2, 3)))
    return jnp.concatenate([mx, av], axis=1)


if __name__ == "__main__":
    key = jax.random.PRNGKey(0)
    x = jax.random.normal(key, (2, 4, 16, 16), dtype=jnp.float32)

    # adaptive (2, 2) output (uniform bins)
    out = jax.block_until_ready(adaptive_concat_pool2d(x, (2, 2)))
    ref = _reference(x, (2, 2))
    assert out.shape == (2, 8, 2, 2), out.shape
    assert jnp.allclose(out, ref, atol=1e-5, rtol=1e-5), "mismatch vs reference (2,2)"

    # global pooling (out_size = 1)
    out1 = jax.block_until_ready(adaptive_concat_pool2d(x, 1))
    ref1 = _reference(x, 1)
    assert out1.shape == (2, 8, 1, 1), out1.shape
    assert jnp.allclose(out1, ref1, atol=1e-5, rtol=1e-5), "mismatch vs reference (1,1)"

    # non-uniform (overlapping) bins
    out2 = jax.block_until_ready(adaptive_concat_pool2d(x, (3, 5)))
    ref2 = _reference(x, (3, 5))
    assert out2.shape == (2, 8, 3, 5), out2.shape
    assert jnp.allclose(out2, ref2, atol=1e-5, rtol=1e-5), "mismatch vs reference (3,5)"

    # identity fast path (out_size = None)
    out3 = jax.block_until_ready(adaptive_concat_pool2d(x, None))
    ref3 = _reference(x, None)
    assert out3.shape == (2, 8, 16, 16), out3.shape
    assert jnp.allclose(out3, ref3, atol=1e-5, rtol=1e-5), "mismatch vs reference (None)"

    print("KERNEL_OK")
</pallas_src>

<mosaic_0001>
module attributes {stable_mosaic.version = 11 : i64} {
  func.func @kernel(%arg0: i32, %arg1: i32, %arg2: memref<2x4x16x16xf32, #tpu.memory_space<vmem>>, %arg3: memref<2x2x4x2x2xf32, #tpu.memory_space<vmem>>) attributes {dimension_semantics = [#tpu.dimension_semantics<parallel>, #tpu.dimension_semantics<parallel>], iteration_bounds = array<i64: 1, 1>, scalar_prefetch = 0 : i64, scratch_operands = 0 : i64, tpu.core_type = #tpu.core_type<tc>, window_params = [{transform_indices = @transform_0, window_bounds = array<i64: 2, 4, 16, 16>}, {transform_indices = @transform_1, window_bounds = array<i64: 2, 2, 4, 2, 2>}]} {
    %c0 = arith.constant 0 : index
    %c0_0 = arith.constant 0 : index
    %c0_1 = arith.constant 0 : index
    %c0_2 = arith.constant 0 : index
    %0 = vector.load %arg2[%c0, %c0_0, %c0_1, %c0_2] : memref<2x4x16x16xf32, #tpu.memory_space<vmem>>, vector<2x4x8x16xf32>
    %cst = arith.constant dense<0xFF800000> : vector<2x4x16xf32>
    %1 = vector.multi_reduction <maximumf>, %0, %cst [2] : vector<2x4x8x16xf32> to vector<2x4x16xf32>
    %2 = vector.shape_cast %1 : vector<2x4x16xf32> to vector<2x4x1x16xf32>
    %cst_3 = arith.constant dense<0.000000e+00> : vector<2x4x16xf32>
    %3 = vector.multi_reduction <add>, %0, %cst_3 [2] : vector<2x4x8x16xf32> to vector<2x4x16xf32>
    %4 = vector.shape_cast %3 : vector<2x4x16xf32> to vector<2x4x1x16xf32>
    %cst_4 = arith.constant 1.250000e-01 : f32
    %5 = vector.broadcast %cst_4 : f32 to vector<2x4x1x16xf32>
    %6 = arith.mulf %4, %5 : vector<2x4x1x16xf32>
    %c0_5 = arith.constant 0 : index
    %c0_6 = arith.constant 0 : index
    %c8 = arith.constant 8 : index
    %c0_7 = arith.constant 0 : index
    %7 = vector.load %arg2[%c0_5, %c0_6, %c8, %c0_7] : memref<2x4x16x16xf32, #tpu.memory_space<vmem>>, vector<2x4x8x16xf32>
    %cst_8 = arith.constant dense<0xFF800000> : vector<2x4x16xf32>
    %8 = vector.multi_reduction <maximumf>, %7, %cst_8 [2] : vector<2x4x8x16xf32> to vector<2x4x16xf32>
    %9 = vector.shape_cast %8 : vector<2x4x16xf32> to vector<2x4x1x16xf32>
    %cst_9 = arith.constant dense<0.000000e+00> : vector<2x4x16xf32>
    %10 = vector.multi_reduction <add>, %7, %cst_9 [2] : vector<2x4x8x16xf32> to vector<2x4x16xf32>
    %11 = vector.shape_cast %10 : vector<2x4x16xf32> to vector<2x4x1x16xf32>
    %cst_10 = arith.constant 1.250000e-01 : f32
    %12 = vector.broadcast %cst_10 : f32 to vector<2x4x1x16xf32>
    %13 = arith.mulf %11, %12 : vector<2x4x1x16xf32>
    %14 = tpu.concatenate %2, %9 in 2 : vector<2x4x1x16xf32>, vector<2x4x1x16xf32> -> vector<2x4x2x16xf32>
    %15 = tpu.concatenate %6, %13 in 2 : vector<2x4x1x16xf32>, vector<2x4x1x16xf32> -> vector<2x4x2x16xf32>
    %16 = vector.extract_strided_slice %14 {offsets = [0, 0, 0, 0], sizes = [2, 4, 2, 8], strides = [1, 1, 1, 1]} : vector<2x4x2x16xf32> to vector<2x4x2x8xf32>
    %cst_11 = arith.constant dense<0xFF800000> : vector<2x4x2xf32>
    %17 = vector.multi_reduction <maximumf>, %16, %cst_11 [3] : vector<2x4x2x8xf32> to vector<2x4x2xf32>
    %18 = vector.shape_cast %17 : vector<2x4x2xf32> to vector<2x4x2x1xf32>
    %19 = vector.extract_strided_slice %15 {offsets = [0, 0, 0, 0], sizes = [2, 4, 2, 8], strides = [1, 1, 1, 1]} : vector<2x4x2x16xf32> to vector<2x4x2x8xf32>
    %cst_12 = arith.constant dense<0.000000e+00> : vector<2x4x2xf32>
    %20 = vector.multi_reduction <add>, %19, %cst_12 [3] : vector<2x4x2x8xf32> to vector<2x4x2xf32>
    %21 = vector.shape_cast %20 : vector<2x4x2xf32> to vector<2x4x2x1xf32>
    %cst_13 = arith.constant 1.250000e-01 : f32
    %22 = vector.broadcast %cst_13 : f32 to vector<2x4x2x1xf32>
    %23 = arith.mulf %21, %22 : vector<2x4x2x1xf32>
    %24 = vector.extract_strided_slice %14 {offsets = [0, 0, 0, 8], sizes = [2, 4, 2, 8], strides = [1, 1, 1, 1]} : vector<2x4x2x16xf32> to vector<2x4x2x8xf32>
    %cst_14 = arith.constant dense<0xFF800000> : vector<2x4x2xf32>
    %25 = vector.multi_reduction <maximumf>, %24, %cst_14 [3] : vector<2x4x2x8xf32> to vector<2x4x2xf32>
    %26 = vector.shape_cast %25 : vector<2x4x2xf32> to vector<2x4x2x1xf32>
    %27 = vector.extract_strided_slice %15 {offsets = [0, 0, 0, 8], sizes = [2, 4, 2, 8], strides = [1, 1, 1, 1]} : vector<2x4x2x16xf32> to vector<2x4x2x8xf32>
    %cst_15 = arith.constant dense<0.000000e+00> : vector<2x4x2xf32>
    %28 = vector.multi_reduction <add>, %27, %cst_15 [3] : vector<2x4x2x8xf32> to vector<2x4x2xf32>
    %29 = vector.shape_cast %28 : vector<2x4x2xf32> to vector<2x4x2x1xf32>
    %cst_16 = arith.constant 1.250000e-01 : f32
    %30 = vector.broadcast %cst_16 : f32 to vector<2x4x2x1xf32>
    %31 = arith.mulf %29, %30 : vector<2x4x2x1xf32>
    %32 = tpu.concatenate %18, %26 in 3 : vector<2x4x2x1xf32>, vector<2x4x2x1xf32> -> vector<2x4x2x2xf32>
    %33 = tpu.concatenate %23, %31 in 3 : vector<2x4x2x1xf32>, vector<2x4x2x1xf32> -> vector<2x4x2x2xf32>
    %34 = vector.shape_cast %32 : vector<2x4x2x2xf32> to vector<2x1x4x2x2xf32>
    %35 = vector.shape_cast %33 : vector<2x4x2x2xf32> to vector<2x1x4x2x2xf32>
    %36 = tpu.concatenate %34, %35 in 1 : vector<2x1x4x2x2xf32>, vector<2x1x4x2x2xf32> -> vector<2x2x4x2x2xf32>
    %c0_17 = arith.constant 0 : index
    %c0_18 = arith.constant 0 : index
    %c0_19 = arith.constant 0 : index
    %c0_20 = arith.constant 0 : index
    %c0_21 = arith.constant 0 : index
    %37 = vector.load %arg3[%c0_17, %c0_18, %c0_19, %c0_20, %c0_21] : memref<2x2x4x2x2xf32, #tpu.memory_space<vmem>>, vector<2x2x4x2x2xf32>
    tpu.vector_store %arg3[%c0_17, %c0_18, %c0_19, %c0_20, %c0_21], %36 {strides = array<i32>} : memref<2x2x4x2x2xf32, #tpu.memory_space<vmem>>, vector<2x2x4x2x2xf32>,
    return
  }
  func.func @transform_0(%arg0: i32, %arg1: i32) -> (i32, i32, i32, i32) {
    %c0_i32 = arith.constant 0 : i32
    %c0_i32_0 = arith.constant 0 : i32
    %c0_i32_1 = arith.constant 0 : i32
    return %arg0, %arg1, %c0_i32, %c0_i32_0 : i32, i32, i32, i32
  }
  func.func @transform_1(%arg0: i32, %arg1: i32) -> (i32, i32, i32, i32, i32) {
    %c0_i32 = arith.constant 0 : i32
    %c0_i32_0 = arith.constant 0 : i32
    %c0_i32_1 = arith.constant 0 : i32
    %c0_i32_2 = arith.constant 0 : i32
    return %arg0, %c0_i32, %arg1, %c0_i32_0, %c0_i32_1 : i32, i32, i32, i32, i32
  }
}

</mosaic_0001>

<bundles_post_ra>
// kernel: tpu_custom_call.1
= control target key start
LH: loop header
LB: loop body
LE: loop exit
PB: predicated region body
PF: predicated region fallthrough
CT: control target
= control target key end

     0   :  { %6 = vsyncpa [#allocation3], 0  ;;  %s507_s6 = smov [#allocation2]   ;;  %s810_s0 = inlined_call_operand.hbm [shape: f32[2,4,16,16], index: 0, kind: input, shape index: {}]   ;;  %s811_s1 = inlined_call_operand.vmem [shape: f32[2,2,4,2,2], index: 1, kind: output, shape index: {}]  }
   0x1   :  { %s12_s7 = sshll.u32 %s507_s6, 4  ;;  %s13_s7 = int_to_ptr.vmem [resolvable:$true] %s12_s7 }
   0x2   :  { %s493_s8 = scalar_lea.vmem %s13_s7, 2048  ;;  %p498_p1 = scmp.lt.s32.totalorder %s13_s7, %s13_s7 }
   0x3   :  { %p494_p0 = scmp.ne.s32.totalorder %s13_s7, %s493_s8  ;;  %p499_p2 = scmp.lt.s32.totalorder %s493_s8, %s493_s8 }
   0x5   :  { %p500_p3 = por %p499_p2, %p498_p1 }
   0x7   :  { %p501_p4 = pnand %p500_p3, %p494_p0 }
   0x9   :  { %504 = shalt.err (!%p501_p4)
}
   0xa   :  { %s508_s9 = smov 128   ;;  %s509_s10 = smov 8  }
   0xb   :  { %18 = dma.hbm_to_vmem [thread:$0]  %s810_s0, 2048, %s13_s7, [#allocation3], %s508_s9, %s508_s9, %s509_s10  }
   0xc   :  { %505 = dma.done.wait [#allocation3], 2048  }
   0xd   :  { %506 = vsyncadd [#allocation3], 4294965248  ;;  %vm30_vm0 = vcmask 130048   ;;  %v524_v0 = vld [vmem:[#allocation2 + $0x20] sm:$0xff]  ;;  %v526_v1 = vld [vmem:[#allocation2 + $0x28] sm:$0xff]  ;;  %vm279_vm1 = vcmask 1040384  }
   0xe   :  { %v528_v2 = vld [vmem:[#allocation2] sm:$0xff]  ;;  %v101_v3 = vsel %vm30_vm0, %v524_v0, 0.0  ;;  %v229_v4 = vsel %vm30_vm0, %v526_v1, 0.0  ;;  %v536_v6 = vld [vmem:[#allocation2 + $0x8] sm:$0xff]  ;;  %v538_v7 = vld [vmem:[#allocation2 + $0x30] sm:$0xff]  ;;  %s510_s0 = smov 120  }
   0xf   :  { %v87_v5 = vsel %vm30_vm0, %v528_v2, 0.0  ;;  %v540_v8 = vld [vmem:[#allocation2 + $0x38] sm:$0xff]  ;;  %v102_v9 = vrot.slane %v101_v3, 4  ;;  %v230_v10 = vrot.slane %v229_v4, 4  ;;  %v215_v12 = vsel %vm30_vm0, %v536_v6, 0.0  ;;  %v544_v13 = vld [vmem:[#allocation2 + $0x10] sm:$0xff] }
  0x10   :  { %v88_v11 = vrot.slane %v87_v5, 4  ;;  %v546_v14 = vld [vmem:[#allocation2 + $0x18] sm:$0xff]  ;;  %v216_v15 = vrot.slane %v215_v12, 4  ;;  %v108_v16 = vsel %vm30_vm0, %v538_v7, 0.0  ;;  %v236_v17 = vsel %vm30_vm0, %v540_v8, 0.0  ;;  %v556_v59 = vld [vmem:[#allocation2 + $0x50] sm:$0xff] }
  0x11   :  { %v94_v18 = vsel %vm30_vm0, %v544_v13, 0.0  ;;  %v103_v19 = vadd.f32 %v102_v9, %v101_v3  ;;  %v231_v20 = vadd.f32 %v230_v10, %v229_v4  ;;  %v109_v22 = vrot.slane %v108_v16, 4  ;;  %v558_v60 = vld [vmem:[#allocation2 + $0x58] sm:$0xff] }
  0x12   :  { %v89_v21 = vadd.f32 %v88_v11, %v87_v5  ;;  %v217_v23 = vadd.f32 %v216_v15, %v215_v12  ;;  %v237_v24 = vrot.slane %v236_v17, 4  ;;  %v95_v25 = vrot.slane %v94_v18, 4  ;;  %v560_v11 = vld [vmem:[#allocation2 + $0x40] sm:$0xff]  ;;  %v562_v12 = vld [vmem:[#allocation2 + $0x48] sm:$0xff] }
  0x13   :  { %v222_v26 = vsel %vm30_vm0, %v546_v14, 0.0  ;;  %v104_v27 = vrot.slane %v103_v19, 2  ;;  %v232_v28 = vrot.slane %v231_v20, 2  ;;  %v110_v30 = vadd.f32 %v109_v22, %v108_v16 }
  0x14   :  { %v90_v29 = vrot.slane %v89_v21, 2  ;;  %v218_v31 = vrot.slane %v217_v23, 2  ;;  %v238_v32 = vadd.f32 %v237_v24, %v236_v17  ;;  %v96_v33 = vadd.f32 %v95_v25, %v94_v18  ;;  %v578_v24 = vld [vmem:[#allocation2 + $0x78] sm:$0xff] }
  0x15   :  { %v223_v34 = vrot.slane %v222_v26, 4  ;;  %v105_v35 = vadd.f32 %v104_v27, %v103_v19  ;;  %v233_v36 = vadd.f32 %v232_v28, %v231_v20  ;;  %v111_v38 = vrot.slane %v110_v30, 2 }
  0x16   :  { %v91_v37 = vadd.f32 %v90_v29, %v89_v21  ;;  %v219_v39 = vadd.f32 %v218_v31, %v217_v23  ;;  %v239_v40 = vrot.slane %v238_v32, 2  ;;  %v97_v41 = vrot.slane %v96_v33, 2  ;;  %v576_v23 = vld [vmem:[#allocation2 + $0x70] sm:$0xff] }
  0x17   :  { %v224_v42 = vadd.f32 %v223_v34, %v222_v26  ;;  %v106_v43 = vrot.slane %v105_v35, 1  ;;  %v234_v44 = vrot.slane %v233_v36, 1  ;;  %v112_v46 = vadd.f32 %v111_v38, %v110_v30 }
  0x18   :  { %v92_v45 = vrot.slane %v91_v37, 1  ;;  %v220_v47 = vrot.slane %v219_v39, 1  ;;  %v240_v48 = vadd.f32 %v239_v40, %v238_v32  ;;  %v98_v49 = vadd.f32 %v97_v41, %v96_v33  ;;  %v589_v33 = vld [vmem:[#allocation2 + $0x60] sm:$0xff] }
  0x19   :  { %v225_v50 = vrot.slane %v224_v42, 2  ;;  %v107_v51 = vadd.f32 %v106_v43, %v105_v35  ;;  %v235_v52 = vadd.f32 %v234_v44, %v233_v36  ;;  %v113_v54 = vrot.slane %v112_v46, 1 }
  0x1a   :  { %v93_v53 = vadd.f32 %v92_v45, %v91_v37  ;;  %v221_v55 = vadd.f32 %v220_v47, %v219_v39  ;;  %v241_v56 = vrot.slane %v240_v48, 1  ;;  %v99_v57 = vrot.slane %v98_v49, 1 }
  0x1b   :  { %v226_v58 = vadd.f32 %v225_v50, %v224_v42  ;;  %v145_v61 = vmul.f32 0.125, %v107_v51  ;;  %v273_v62 = vmul.f32 0.125, %v235_v52  ;;  %v114_v3 = vadd.f32 %v113_v54, %v112_v46  ;;  %v600_v42 = vld [vmem:[#allocation2 + $0x68] sm:$0xff] }
  0x1c   :  { %v143_v63 = vmul.f32 0.125, %v93_v53  ;;  %v271_v4 = vmul.f32 0.125, %v221_v55  ;;  %v242_v5 = vadd.f32 %v241_v56, %v240_v48  ;;  %v100_v9 = vadd.f32 %v99_v57, %v98_v49 }
  0x1d   :  { %v227_v10 = vrot.slane %v226_v58, 1  ;;  %v565_v15 = vsel %vm279_vm1, %v145_v61, %v273_v62  ;;  %v146_v16 = vmul.f32 0.125, %v114_v3  ;;  %v122_v17 = vsel %vm30_vm0, %v556_v59, 0.0 }
  0x1e   :  { %v250_v18 = vsel %vm30_vm0, %v558_v60, 0.0  ;;  %390 = vrot.lane.b32.xlu1 %v565_v15, %s510_s0  ;;  %v574_v19 = vsel %vm279_vm1, %v143_v63, %v271_v4  ;;  %v274_v20 = vmul.f32 0.125, %v242_v5  ;;  %v144_v21 = vmul.f32 0.125, %v100_v9 }
  0x1f   :  { %v228_v22 = vadd.f32 %v227_v10, %v226_v58  ;;  %386 = vrot.lane.b32.xlu0 %v574_v19, %s510_s0  ;;  %v123_v25 = vrot.slane %v122_v17, 4  ;;  %v251_v26 = vrot.slane %v250_v18, 4  ;;  %v115_v27 = vsel %vm30_vm0, %v560_v11, 0.0 }
  0x20   :  { %v243_v28 = vsel %vm30_vm0, %v562_v12, 0.0  ;;  %v587_v29 = vsel %vm279_vm1, %v146_v16, %v274_v20  ;;  %v116_v31 = vrot.slane %v115_v27, 4  ;;  %v136_v36 = vsel %vm30_vm0, %v576_v23, 0.0 }
  0x21   :  { %v272_v30 = vmul.f32 0.125, %v228_v22  ;;  %v244_v32 = vrot.slane %v243_v28, 4  ;;  %v124_v34 = vadd.f32 %v123_v25, %v122_v17  ;;  %v252_v35 = vadd.f32 %v251_v26, %v250_v18 }
  0x22   :  { %v264_v37 = vsel %vm30_vm0, %v578_v24, 0.0  ;;  %392 = vrot.lane.b32.xlu1 %v587_v29, %s510_s0  ;;  %v117_v39 = vadd.f32 %v116_v31, %v115_v27  ;;  %v137_v41 = vrot.slane %v136_v36, 4  ;;  %v129_v46 = vsel %vm30_vm0, %v589_v33, 0.0 }
  0x23   :  { %v598_v38 = vsel %vm279_vm1, %v144_v21, %v272_v30  ;;  %v245_v40 = vadd.f32 %v244_v32, %v243_v28  ;;  %v125_v43 = vrot.slane %v124_v34, 2  ;;  %v253_v44 = vrot.slane %v252_v35, 2 }
  0x24   :  { %388 = vrot.lane.b32.xlu0 %v598_v38, %s510_s0  ;;  %v265_v45 = vrot.slane %v264_v37, 4  ;;  %v118_v47 = vrot.slane %v117_v39, 2  ;;  %v138_v49 = vadd.f32 %v137_v41, %v136_v36  ;;  %v130_v50 = vrot.slane %v129_v46, 4 }
  0x25   :  { %v246_v48 = vrot.slane %v245_v40, 2  ;;  %v126_v51 = vadd.f32 %v125_v43, %v124_v34  ;;  %v254_v52 = vadd.f32 %v253_v44, %v252_v35  ;;  %v257_v54 = vsel %vm30_vm0, %v600_v42, 0.0 }
  0x26   :  { %v266_v53 = vadd.f32 %v265_v45, %v264_v37  ;;  %v119_v55 = vadd.f32 %v118_v47, %v117_v39  ;;  %v139_v57 = vrot.slane %v138_v49, 2  ;;  %v131_v58 = vadd.f32 %v130_v50, %v129_v46 }
  0x27   :  { %v247_v56 = vadd.f32 %v246_v48, %v245_v40  ;;  %v127_v61 = vrot.slane %v126_v51, 1  ;;  %v255_v62 = vrot.slane %v254_v52, 1  ;;  %v258_v3 = vrot.slane %v257_v54, 4 }
  0x28   :  { %v267_v63 = vrot.slane %v266_v53, 2  ;;  %v120_v4 = vrot.slane %v119_v55, 1  ;;  %v140_v9 = vadd.f32 %v139_v57, %v138_v49  ;;  %v132_v10 = vrot.slane %v131_v58, 2 }
  0x29   :  { %v248_v5 = vrot.slane %v247_v56, 1  ;;  %v128_v16 = vadd.f32 %v127_v61, %v126_v51  ;;  %v256_v17 = vadd.f32 %v255_v62, %v254_v52  ;;  %v259_v20 = vadd.f32 %v258_v3, %v257_v54 }
  0x2a   :  { %v268_v18 = vadd.f32 %v267_v63, %v266_v53  ;;  %v121_v21 = vadd.f32 %v120_v4, %v119_v55  ;;  %v141_v25 = vrot.slane %v140_v9, 1  ;;  %v133_v26 = vadd.f32 %v132_v10, %v131_v58 }
  0x2b   :  { %v249_v22 = vadd.f32 %v248_v5, %v247_v56  ;;  %v148_v27 = vmul.f32 0.125, %v128_v16  ;;  %v276_v28 = vmul.f32 0.125, %v256_v17  ;;  %v260_v31 = vrot.slane %v259_v20, 2 }
  0x2c   :  { %v269_v30 = vrot.slane %v268_v18, 1  ;;  %v147_v32 = vmul.f32 0.125, %v121_v21  ;;  %v142_v35 = vadd.f32 %v141_v25, %v140_v9  ;;  %v134_v36 = vrot.slane %v133_v26, 1 }
  0x2d   :  { %v275_v34 = vmul.f32 0.125, %v249_v22  ;;  %v609_v37 = vsel %vm279_vm1, %v148_v27, %v276_v28  ;;  %v261_v40 = vadd.f32 %v260_v31, %v259_v20  ;;  %v31_v47 = vsel %vm30_vm0, %v528_v2, -inf }
  0x2e   :  { %v270_v39 = vadd.f32 %v269_v30, %v268_v18  ;;  %396 = vrot.lane.b32.xlu1 %v609_v37, %s510_s0  ;;  %v150_v43 = vmul.f32 0.125, %v142_v35  ;;  %v135_v44 = vadd.f32 %v134_v36, %v133_v26  ;;  %v32_v49 = vrot.slane %v31_v47, 4 }
  0x2f   :  { %v614_v41 = vsel %vm279_vm1, %v147_v32, %v275_v34  ;;  %v262_v46 = vrot.slane %v261_v40, 1  ;;  %v159_v50 = vsel %vm30_vm0, %v536_v6, -inf  ;;  %v45_v54 = vsel %vm30_vm0, %v524_v0, -inf }
  0x30   :  { %394 = vrot.lane.b32.xlu0 %v614_v41, %s510_s0  ;;  %v278_v45 = vmul.f32 0.125, %v270_v39  ;;  %v149_v48 = vmul.f32 0.125, %v135_v44  ;;  %v160_v53 = vrot.slane %v159_v50, 4  ;;  %v33_v55 = vmax.f32 %v31_v47, %v32_v49 }
  0x31   :  { %v263_v52 = vadd.f32 %v262_v46, %v261_v40  ;;  %v46_v56 = vrot.slane %v45_v54, 4  ;;  %v173_v2 = vsel %vm30_vm0, %v526_v1, -inf  ;;  %v59_v62 = vsel %vm30_vm0, %v560_v11, -inf }
  0x32   :  { %v623_v51 = vsel %vm279_vm1, %v150_v43, %v278_v45  ;;  %v174_v58 = vrot.slane %v173_v2, 4  ;;  %v161_v61 = vmax.f32 %v159_v50, %v160_v53  ;;  %v187_v63 = vsel %vm30_vm0, %v562_v12, -inf }
  0x33   :  { %400 = vrot.lane.b32.xlu1 %v623_v51, %s510_s0  ;;  %v277_v57 = vmul.f32 0.125, %v263_v52  ;;  %v47_v6 = vmax.f32 %v45_v54, %v46_v56  ;;  %v60_v4 = vrot.slane %v59_v62, 4  ;;  %v34_v5 = vrot.slane %v33_v55, 2 }
  0x34   :  { %v175_v3 = vmax.f32 %v173_v2, %v174_v58  ;;  %v188_v9 = vrot.slane %v187_v63, 4  ;;  %v73_v17 = vsel %vm30_vm0, %v589_v33, -inf  ;;  %v162_v11 = vrot.slane %v161_v61, 2 }
  0x35   :  { %v636_v0 = vsel %vm279_vm1, %v149_v48, %v277_v57  ;;  %v48_v1 = vrot.slane %v47_v6, 2  ;;  %v61_v16 = vmax.f32 %v59_v62, %v60_v4  ;;  %v74_v12 = vrot.slane %v73_v17, 4 }
  0x36   :  { %398 = vrot.lane.b32.xlu0 %v636_v0, %s510_s0  ;;  %v176_v10 = vrot.slane %v175_v3, 2  ;;  %v189_v20 = vmax.f32 %v187_v63, %v188_v9  ;;  %v201_v25 = vsel %vm30_vm0, %v600_v42, -inf  ;;  %v35_v26 = vmax.f32 %v33_v55, %v34_v5 }
  0x37   :  { %v49_v18 = vmax.f32 %v47_v6, %v48_v1  ;;  %v62_v22 = vrot.slane %v61_v16, 2  ;;  %v75_v30 = vmax.f32 %v73_v17, %v74_v12  ;;  %v202_v34 = vrot.slane %v201_v25, 4 }
  0x38   :  { %v177_v21 = vmax.f32 %v175_v3, %v176_v10  ;;  %v190_v28 = vrot.slane %v189_v20, 2  ;;  %v163_v35 = vmax.f32 %v161_v61, %v162_v11  ;;  %v36_v45 = vrot.slane %v35_v26, 1 }
  0x39   :  { %v50_v27 = vrot.slane %v49_v18, 1  ;;  %v63_v32 = vmax.f32 %v61_v16, %v62_v22  ;;  %v76_v33 = vrot.slane %v75_v30, 2  ;;  %v203_v44 = vmax.f32 %v201_v25, %v202_v34 }
  0x3a   :  { %v178_v31 = vrot.slane %v177_v21, 1  ;;  %v191_v39 = vmax.f32 %v189_v20, %v190_v28  ;;  %v38_v50 = vsel %vm30_vm0, %v544_v13, -inf  ;;  %v164_v52 = vrot.slane %v163_v35, 1 }
  0x3b   :  { %v51_v36 = vmax.f32 %v49_v18, %v50_v27  ;;  %v64_v43 = vrot.slane %v63_v32, 1  ;;  %v77_v47 = vmax.f32 %v75_v30, %v76_v33  ;;  %v204_v49 = vrot.slane %v203_v44, 2 }
  0x3c   :  { %v179_v40 = vmax.f32 %v177_v21, %v178_v31  ;;  %v192_v46 = vrot.slane %v191_v39, 1  ;;  %v39_v55 = vrot.slane %v38_v50, 4  ;;  %v166_v2 = vsel %vm30_vm0, %v546_v14, -inf }
  0x3d   :  { %v65_v42 = vmax.f32 %v63_v32, %v64_v43  ;;  %v78_v54 = vrot.slane %v77_v47, 1  ;;  %v205_v56 = vmax.f32 %v203_v44, %v204_v49  ;;  %v52_v57 = vsel %vm30_vm0, %v538_v7, -inf }
  0x3e   :  { %v645_v48 = vsel %vm279_vm1, %v51_v36, %v179_v40  ;;  %v193_v53 = vmax.f32 %v191_v39, %v192_v46  ;;  %v180_v58 = vsel %vm30_vm0, %v540_v8, -inf  ;;  %v37_v61 = vmax.f32 %v35_v26, %v36_v45 }
  0x3f   :  { %v40_v62 = vmax.f32 %v38_v50, %v39_v55  ;;  %v167_v13 = vrot.slane %v166_v2, 4  ;;  %v79_v63 = vmax.f32 %v77_v47, %v78_v54  ;;  %v206_v3 = vrot.slane %v205_v56, 1 }
  0x40   :  { %v656_v6 = vsel %vm279_vm1, %v65_v42, %v193_v53  ;;  %v53_v4 = vrot.slane %v52_v57, 4  ;;  %v181_v5 = vrot.slane %v180_v58, 4  ;;  %v66_v14 = vsel %vm30_vm0, %v556_v59, -inf }
  0x41   :  { %v41_v1 = vrot.slane %v40_v62, 2  ;;  %v168_v9 = vmax.f32 %v166_v2, %v167_v13  ;;  %v194_v7 = vsel %vm30_vm0, %v558_v60, -inf  ;;  %v207_v10 = vmax.f32 %v205_v56, %v206_v3 }
  0x42   :  { %v54_v8 = vmax.f32 %v52_v57, %v53_v4  ;;  %v182_v16 = vmax.f32 %v180_v58, %v181_v5  ;;  %v67_v17 = vrot.slane %v66_v14, 4  ;;  %v195_v20 = vrot.slane %v194_v7, 4 }
  0x43   :  { %v42_v11 = vmax.f32 %v40_v62, %v41_v1  ;;  %v169_v18 = vrot.slane %v168_v9, 2  ;;  %v80_v12 = vsel %vm30_vm0, %v576_v23, -inf  ;;  %v665_v21 = vsel %vm279_vm1, %v79_v63, %v207_v10 }
  0x44   :  { %v55_v22 = vrot.slane %v54_v8, 2  ;;  %v183_v25 = vrot.slane %v182_v16, 2  ;;  %v68_v26 = vmax.f32 %v66_v14, %v67_v17  ;;  %v165_v59 = vmax.f32 %v163_v35, %v164_v52 }
  0x45   :  { %v43_v27 = vrot.slane %v42_v11, 1  ;;  %v170_v28 = vmax.f32 %v168_v9, %v169_v18  ;;  %v196_v60 = vmax.f32 %v194_v7, %v195_v20  ;;  %v81_v34 = vrot.slane %v80_v12, 4 }
  0x46   :  { %v56_v30 = vmax.f32 %v54_v8, %v55_v22  ;;  %v184_v31 = vmax.f32 %v182_v16, %v183_v25  ;;  %v69_v32 = vrot.slane %v68_v26, 2  ;;  %v208_v23 = vsel %vm30_vm0, %v578_v24, -inf }
  0x47   :  { %v44_v36 = vmax.f32 %v42_v11, %v43_v27  ;;  %v171_v39 = vrot.slane %v170_v28, 1  ;;  %v197_v33 = vrot.slane %v196_v60, 2  ;;  %v82_v45 = vmax.f32 %v80_v12, %v81_v34 }
  0x48   :  { %v57_v40 = vrot.slane %v56_v30, 1  ;;  %v185_v43 = vrot.slane %v184_v31, 1  ;;  %v70_v44 = vmax.f32 %v68_v26, %v69_v32  ;;  %v209_v35 = vrot.slane %v208_v23, 4 }
  0x49   :  { %v172_v46 = vmax.f32 %v170_v28, %v171_v39  ;;  %v198_v47 = vmax.f32 %v196_v60, %v197_v33  ;;  %v83_v52 = vrot.slane %v82_v45, 2  ;;  %v280_v56 = vsel %vm279_vm1, %v37_v61, %v165_v59 }
  0x4a   :  { %v58_v42 = vmax.f32 %v56_v30, %v57_v40  ;;  %v186_v49 = vmax.f32 %v184_v31, %v185_v43  ;;  %v71_v50 = vrot.slane %v70_v44, 1  ;;  %v210_v55 = vmax.f32 %v208_v23, %v209_v35 }
  0x4b   :  { %v281_v53 = vsel %vm279_vm1, %v44_v36, %v172_v46  ;;  %v199_v54 = vrot.slane %v198_v47, 1  ;;  %v84_v57 = vmax.f32 %v82_v45, %v83_v52  ;;  %vm296_vm2 = vcmask 58368  }
  0x4c   :  { %v283_v2 = vsel %vm279_vm1, %v58_v42, %v186_v49  ;;  %v72_v24 = vmax.f32 %v70_v44, %v71_v50  ;;  %v211_v62 = vrot.slane %v210_v55, 2  ;;  %v297_v63 = vsel %vm296_vm2, %v280_v56, -inf }
  0x4d   :  { %v200_v58 = vmax.f32 %v198_v47, %v199_v54  ;;  %v85_v13 = vrot.slane %v84_v57, 1  ;;  %v321_v5 = vsel %vm296_vm2, %v574_v19, 0.0  ;;  %v324_v61 = vsel %vm296_vm2, %v598_v38, 0.0 }
  0x4e   :  { %v212_v4 = vmax.f32 %v210_v55, %v211_v62  ;;  %v330_v7 = vsel %vm296_vm2, %v587_v29, 0.0  ;;  %v327_v8 = vsel %vm296_vm2, %v565_v15, 0.0  ;;  %v336_v19 = vsel %vm296_vm2, %v609_v37, 0.0 }
  0x4f   :  { %v285_v3 = vsel %vm279_vm1, %v72_v24, %v200_v58  ;;  %v86_v1 = vmax.f32 %v84_v57, %v85_v13  ;;  %v333_v38 = vsel %vm296_vm2, %v614_v41, 0.0  ;;  %v342_v16 = vsel %vm296_vm2, %v623_v51, 0.0 }
  0x50   :  { %v213_v9 = vrot.slane %v212_v4, 1  ;;  %v339_v29 = vsel %vm296_vm2, %v636_v0, 0.0  ;;  %v303_v17 = vsel %vm296_vm2, %v645_v48, -inf  ;;  %v300_v15 = vsel %vm296_vm2, %v281_v53, -inf }
  0x51   :  { %v309_v37 = vsel %vm296_vm2, %v656_v6, -inf  ;;  %v306_v41 = vsel %vm296_vm2, %v283_v2, -inf  ;;  %v315_v51 = vsel %vm296_vm2, %v665_v21, -inf  ;;  %vm353_vm3 = vcmask 123968  }
  0x52   :  { %v214_v14 = vmax.f32 %v212_v4, %v213_v9  ;;  %v312_v0 = vsel %vm296_vm2, %v285_v3, -inf  ;;  %v354_v11 = vsel %vm353_vm3, %v280_v56, -inf  ;;  %v360_v20 = vsel %vm353_vm3, %v645_v48, -inf }
  0x53   :  { %v357_v12 = vsel %vm353_vm3, %v281_v53, -inf  ;;  %v366_v22 = vsel %vm353_vm3, %v656_v6, -inf  ;;  %v363_v25 = vsel %vm353_vm3, %v283_v2, -inf  ;;  %v369_v26 = vsel %vm353_vm3, %v285_v3, -inf }
  0x54   :  { %v681_v10 = vsel %vm279_vm1, %v86_v1, %v214_v14  ;;  %v372_v40 = vsel %vm353_vm3, %v665_v21, -inf  ;;  %vm442_vm4 = vcmask 7168   ;;  %vm459_vm5 = vcmask 9216  }
  0x55   :  { %298 = vmax.xlane.f32.xlu0 %v297_v63  ;;  %v318_v18 = vsel %vm296_vm2, %v681_v10, -inf  ;;  %v375_v45 = vsel %vm353_vm3, %v681_v10, -inf }
  0x57   :  { %322 = vadd.xlane.f32.xlu1 %v321_v5 }
  0x59   :  { %325 = vadd.xlane.f32.xlu0 %v324_v61 }
  0x5b   :  { %331 = vadd.xlane.f32.xlu1 %v330_v7 }
  0x5d   :  { %328 = vadd.xlane.f32.xlu0 %v327_v8 }
  0x5f   :  { %337 = vadd.xlane.f32.xlu1 %v336_v19 }
  0x61   :  { %334 = vadd.xlane.f32.xlu0 %v333_v38 }
  0x63   :  { %343 = vadd.xlane.f32.xlu1 %v342_v16 }
  0x65   :  { %340 = vadd.xlane.f32.xlu0 %v339_v29 }
  0x67   :  { %304 = vmax.xlane.f32.xlu1 %v303_v17 }
  0x69   :  { %301 = vmax.xlane.f32.xlu0 %v300_v15 }
  0x6b   :  { %310 = vmax.xlane.f32.xlu1 %v309_v37 }
  0x6d   :  { %307 = vmax.xlane.f32.xlu0 %v306_v41 }
  0x6f   :  { %316 = vmax.xlane.f32.xlu1 %v315_v51 }
  0x71   :  { %313 = vmax.xlane.f32.xlu0 %v312_v0 }
  0x73   :  { %355 = vmax.xlane.f32.xlu1 %v354_v11 }
  0x75   :  { %319 = vmax.xlane.f32.xlu0 %v318_v18 }
  0x77   :  { %361 = vmax.xlane.f32.xlu1 %v360_v20 }
  0x79   :  { %358 = vmax.xlane.f32.xlu0 %v357_v12 }
  0x7b   :  { %367 = vmax.xlane.f32.xlu1 %v366_v22 }
  0x7d   :  { %364 = vmax.xlane.f32.xlu0 %v363_v25 }
  0x81   :  { %370 = vmax.xlane.f32.xlu0 %v369_v26 }
  0x90   :  { %v391_v59 = vpop.permute.xlu1 %390 }
  0x91   :  { %v387_v27 = vpop.permute.xlu0 %386  ;;  %v416_v48 = vsel %vm296_vm2, %v391_v59, 0.0 }
  0x92   :  { %v410_v28 = vsel %vm296_vm2, %v387_v27, 0.0 }
  0x93   :  { %411 = vadd.xlane.f32.xlu0 %v410_v28 }
  0x94   :  { %v393_v30 = vpop.permute.xlu1 %392 }
  0x95   :  { %v419_v6 = vsel %vm296_vm2, %v393_v30, 0.0 }
  0x96   :  { %v389_v60 = vpop.permute.xlu0 %388 }
  0x97   :  { %v413_v31 = vsel %vm296_vm2, %v389_v60, 0.0  ;;  %417 = vadd.xlane.f32.xlu0 %v416_v48 }
  0x98   :  { %414 = vadd.xlane.f32.xlu1 %v413_v31 }
  0x9c   :  { %420 = vadd.xlane.f32.xlu1 %v419_v6 }
  0xa0   :  { %v397_v32 = vpop.permute.xlu1 %396 }
  0xa1   :  { %v425_v36 = vsel %vm296_vm2, %v397_v32, 0.0 }
  0xa2   :  { %v395_v34 = vpop.permute.xlu0 %394  ;;  %426 = vadd.xlane.f32.xlu1 %v425_v36 }
  0xa3   :  { %v422_v39 = vsel %vm296_vm2, %v395_v34, 0.0 }
  0xa4   :  { %423 = vadd.xlane.f32.xlu0 %v422_v39 }
  0xa5   :  { %v401_v33 = vpop.permute.xlu1 %400 }
  0xa6   :  { %v431_v23 = vsel %vm296_vm2, %v401_v33, 0.0 }
  0xa7   :  { %432 = vadd.xlane.f32.xlu1 %v431_v23 }
  0xa8   :  { %v399_v43 = vpop.permute.xlu0 %398 }
  0xa9   :  { %v428_v44 = vsel %vm296_vm2, %v399_v43, 0.0 }
  0xaa   :  { %429 = vadd.xlane.f32.xlu0 %v428_v44 }
  0xab   :  { %373 = vmax.xlane.f32.xlu1 %v372_v40 }
  0xae   :  { %376 = vmax.xlane.f32.xlu0 %v375_v45 }
  0xde   :  { %v299_v46 = vpop.xlane.xlu0 %298 }
  0xe0   :  { %v323_v47 = vpop.xlane.xlu1 %322 }
  0xe1   :  { %v345_v19 = vmul.f32 0.125, %v323_v47 }
  0xe2   :  { %v326_v35 = vpop.xlane.xlu0 %325 }
  0xe3   :  { %v346_v15 = vmul.f32 0.125, %v326_v35 }
  0xe4   :  { %v332_v42 = vpop.xlane.xlu1 %331 }
  0xe5   :  { %v348_v20 = vmul.f32 0.125, %v332_v42 }
  0xe6   :  { %v329_v49 = vpop.xlane.xlu0 %328 }
  0xe7   :  { %v347_v37 = vmul.f32 0.125, %v329_v49 }
  0xe8   :  { %v338_v50 = vpop.xlane.xlu1 %337 }
  0xe9   :  { %v350_v26 = vmul.f32 0.125, %v338_v50 }
  0xea   :  { %v335_v52 = vpop.xlane.xlu0 %334 }
  0xeb   :  { %v349_v28 = vmul.f32 0.125, %v335_v52 }
  0xec   :  { %v344_v53 = vpop.xlane.xlu1 %343 }
  0xed   :  { %v352_v6 = vmul.f32 0.125, %v344_v53 }
  0xee   :  { %v724_v54 = vpop.xlane.xlu0 %340 }
  0xef   :  { %v351_v33 = vmul.f32 0.125, %v724_v54 }
  0xf0   :  { %v305_v21 = vpop.xlane.xlu1 %304 }
  0xf2   :  { %v302_v55 = vpop.xlane.xlu0 %301 }
  0xf4   :  { %v311_v56 = vpop.xlane.xlu1 %310 }
  0xf6   :  { %v308_v2 = vpop.xlane.xlu0 %307 }
  0xf8   :  { %v726_v24 = vpop.xlane.xlu1 %316 }
  0xfa   :  { %v314_v57 = vpop.xlane.xlu0 %313 }
  0xfc   :  { %v356_v58 = vpop.xlane.xlu1 %355 }
  0xfd   :  { %v443_v62 = vsel %vm442_vm4, %v299_v46, %v356_v58 }
  0xfe   :  { %460 = vst.msk [vmem:[%s811_s1] sm:$0x3] %vm459_vm5, %v443_v62  ;;  %v320_v13 = vpop.xlane.xlu0 %319 }
 0x100   :  { %v362_v63 = vpop.xlane.xlu1 %361 }
 0x101   :  { %v445_v3 = vsel %vm442_vm4, %v305_v21, %v362_v63 }
 0x102   :  { %462 = vst.msk [vmem:[%s811_s1 + $0x4] sm:$0x3] %vm459_vm5, %v445_v3  ;;  %v359_v4 = vpop.xlane.xlu0 %358 }
 0x103   :  { %v444_v5 = vsel %vm442_vm4, %v302_v55, %v359_v4 }
 0x104   :  { %v368_v1 = vpop.xlane.xlu1 %367  ;;  %461 = vst.msk [vmem:[%s811_s1 + $0x2] sm:$0x3] %vm459_vm5, %v444_v5 }
 0x105   :  { %v447_v9 = vsel %vm442_vm4, %v311_v56, %v368_v1 }
 0x106   :  { %468 = vst.msk [vmem:[%s811_s1 + $0x10] sm:$0x3] %vm459_vm5, %v447_v9  ;;  %v365_v61 = vpop.xlane.xlu0 %364 }
 0x107   :  { %v446_v14 = vsel %vm442_vm4, %v308_v2, %v365_v61 }
 0x108   :  { %463 = vst.msk [vmem:[%s811_s1 + $0x6] sm:$0x3] %vm459_vm5, %v446_v14 }
 0x10a   :  { %v371_v7 = vpop.xlane.xlu0 %370 }
 0x10b   :  { %v448_v10 = vsel %vm442_vm4, %v314_v57, %v371_v7 }
 0x10c   :  { %469 = vst.msk [vmem:[%s811_s1 + $0x12] sm:$0x3] %vm459_vm5, %v448_v10 }
 0x11c   :  { %v412_v8 = vpop.xlane.xlu0 %411 }
 0x11d   :  { %v434_v38 = vmul.f32 0.125, %v412_v8 }
 0x11f   :  { %v451_v16 = vsel %vm442_vm4, %v345_v19, %v434_v38 }
 0x120   :  { %464 = vst.msk [vmem:[%s811_s1 + $0x8] sm:$0x3] %vm459_vm5, %v451_v16  ;;  %v418_v17 = vpop.xlane.xlu0 %417 }
 0x121   :  { %v415_v29 = vpop.xlane.xlu1 %414  ;;  %v436_v51 = vmul.f32 0.125, %v418_v17 }
 0x122   :  { %v435_v41 = vmul.f32 0.125, %v415_v29 }
 0x123   :  { %v453_v11 = vsel %vm442_vm4, %v347_v37, %v436_v51 }
 0x124   :  { %v452_v0 = vsel %vm442_vm4, %v346_v15, %v435_v41  ;;  %466 = vst.msk [vmem:[%s811_s1 + $0xc] sm:$0x3] %vm459_vm5, %v453_v11 }
 0x125   :  { %465 = vst.msk [vmem:[%s811_s1 + $0xa] sm:$0x3] %vm459_vm5, %v452_v0  ;;  %v421_v18 = vpop.xlane.xlu1 %420 }
 0x126   :  { %v437_v12 = vmul.f32 0.125, %v421_v18 }
 0x128   :  { %v454_v22 = vsel %vm442_vm4, %v348_v20, %v437_v12 }
 0x129   :  { %467 = vst.msk [vmem:[%s811_s1 + $0xe] sm:$0x3] %vm459_vm5, %v454_v22 }
 0x12b   :  { %v427_v25 = vpop.xlane.xlu1 %426 }
 0x12c   :  { %v439_v27 = vmul.f32 0.125, %v427_v25 }
 0x12d   :  { %v424_v59 = vpop.xlane.xlu0 %423 }
 0x12e   :  { %v438_v48 = vmul.f32 0.125, %v424_v59  ;;  %v456_v60 = vsel %vm442_vm4, %v350_v26, %v439_v27 }
 0x12f   :  { %473 = vst.msk [vmem:[%s811_s1 + $0x1a] sm:$0x3] %vm459_vm5, %v456_v60 }
 0x130   :  { %v455_v30 = vsel %vm442_vm4, %v349_v28, %v438_v48  ;;  %v433_v31 = vpop.xlane.xlu1 %432 }
 0x131   :  { %472 = vst.msk [vmem:[%s811_s1 + $0x18] sm:$0x3] %vm459_vm5, %v455_v30  ;;  %v441_v32 = vmul.f32 0.125, %v433_v31 }
 0x133   :  { %v458_v34 = vsel %vm442_vm4, %v352_v6, %v441_v32  ;;  %v430_v36 = vpop.xlane.xlu0 %429 }
 0x134   :  { %475 = vst.msk [vmem:[%s811_s1 + $0x1e] sm:$0x3] %vm459_vm5, %v458_v34  ;;  %v374_v39 = vpop.xlane.xlu1 %373  ;;  %v440_v23 = vmul.f32 0.125, %v430_v36 }
 0x135   :  { %v449_v40 = vsel %vm442_vm4, %v726_v24, %v374_v39 }
 0x136   :  { %470 = vst.msk [vmem:[%s811_s1 + $0x14] sm:$0x3] %vm459_vm5, %v449_v40  ;;  %v457_v43 = vsel %vm442_vm4, %v351_v33, %v440_v23 }
 0x137   :  { %474 = vst.msk [vmem:[%s811_s1 + $0x1c] sm:$0x3] %vm459_vm5, %v457_v43  ;;  %v377_v44 = vpop.xlane.xlu0 %376 }
 0x138   :  { %v450_v45 = vsel %vm442_vm4, %v320_v13, %v377_v44 }
 0x139   :  { %471 = vst.msk [vmem:[%s811_s1 + $0x16] sm:$0x3] %vm459_vm5, %v450_v45 }
 0x13a   :  { %480 = vsyncpa [#allocation3], 1 }

</bundles_post_ra>
